<compile_context>
chip_gen: v6e
topology: v6e:2x2x1
jax: 0.10.0
libtpu: 0.0.40
codegen_flags: <defaults>
</compile_context>

<pallas_src>
import jax
import jax.numpy as jnp
from jax.experimental import pallas as pl
from jax.experimental.pallas import tpu as pltpu

# hyper-params of the synthetic instantiation
B, D_IN, N_BITS, D_DEC, D_OUT = 8, 32, 16, 32, 32
ENCODER_ENTROPY_COEFF = 0.1
DECODER_ENTROPY_COEFF = 0.0  # unused by forward (kept for parity with __init__)

# ---- packed activation-slab column layout (lane-dense (B, 128) input) --------
ACT_W = 128
_A_X = 0                          # encoder input x            (D_IN wide)
_A_ONE = _A_X + D_IN              # ones column (bias folding)
_A_DEC = _A_ONE + 1               # decoder_input              (D_DEC wide)
_A_LAB = _A_DEC + D_DEC           # labels                     (D_OUT wide)
_A_U = _A_LAB + D_OUT             # uniform noise u            (N_BITS wide)
_ACT_USED = _A_U + N_BITS         # = 113

# ---- fused-matmul output column layout (width 64) -----------------------------
_M_SCORES = 0                     # encoder logits             (N_BITS wide)
_M_BASE = _M_SCORES + N_BITS      # baseline                   (1 wide)
_M_DEC = _M_BASE + 1              # decoder output columns     (D_OUT wide)
_M_USED = _M_DEC + D_OUT          # = 49
W_COLS = 64

# ---- packed weight buffer rows -------------------------------------------------
W_MM1_ROWS = ACT_W                # 128 rows: one per activation-slab column
W_Z_ROW = W_MM1_ROWS              # start of the z-matmul rows
W_ROWS = W_Z_ROW + N_BITS         # = 144

# ---- packed output-slab column layout (lane-dense (B, 128) output) ------------
OUT_W = 128
_COL_FULL = 0                     # per-sample full surrogate (mean -> full_loss)
_COL_LOSS = 1                     # per-sample loss
_COL_BASE = 2                     # per-sample baseline
_COL_ENT = 3                      # per-sample encoder entropy
_COL_SCORES = 4                   # encoder logits             (N_BITS wide)
_COL_Z = _COL_SCORES + N_BITS     # sampled latent z           (N_BITS wide)
_COL_DEC = _COL_Z + N_BITS        # decoder output             (D_OUT wide)
_USED_COLS = _COL_DEC + D_OUT     # = 68

assert _ACT_USED <= ACT_W and _M_USED <= W_COLS and _USED_COLS <= OUT_W
assert N_BITS <= D_OUT            # merged-reduce lane padding assumes this


def nvil_kernel(act_ref, w_ref, out_ref):
    act = act_ref[...]                  # (TB, 128) = [x | 1 | dec_in | labels | u | 0]
    w = w_ref[...]                      # (144, 64) fused, bias-folded weights
    tb = act.shape[0]

    # ---- MXU push #1: encoder scores, baseline and the (dec_in, bias) part of
    #      the decoder, all in one matmul over the whole 128-wide activation
    #      slab (zero weight rows mask the labels / u / pad columns). ----------
    mm1 = jnp.dot(act, w[:W_MM1_ROWS], preferred_element_type=jnp.float32)  # (TB, 64)
    scores = mm1[:, _M_SCORES:_M_SCORES + N_BITS]
    baseline = mm1[:, _M_BASE:_M_BASE + 1]

    # ---- Bernoulli sample + entropy / log-prob summands ----------------------
    # sign-stable softplus pair; sigmoid recovered as exp(-softplus(-s)):
    # one EUP softplus + one EUP exp in total.
    sp_abs = jax.nn.softplus(-jnp.abs(scores))
    sp_pos = jnp.maximum(scores, 0.0) + sp_abs      # softplus(s)  = -log(1-p)
    sp_neg = sp_pos - scores                        # softplus(-s) = -log(p)   (exact)
    p = jnp.exp(-sp_neg)                            # sigmoid(s)

    u = act[:, _A_U:_A_U + N_BITS]
    z = (u < p).astype(jnp.float32)                 # (TB, N_BITS)

    ent_summand = sp_pos - p * scores               # = p*sp_neg + (1-p)*sp_pos
    lp_summand = z * scores - sp_pos                # Bernoulli(logits=s).log_prob(z)

    # ---- MXU push #2: decoder contribution of z, placed at the same output
    #      columns, so a single add completes the decoder. --------------------
    total = mm1 + jnp.dot(z, w[W_Z_ROW:], preferred_element_type=jnp.float32)
    dec_out = total[:, _M_DEC:_M_DEC + D_OUT]       # (TB, D_OUT)

    diff = dec_out - act[:, _A_LAB:_A_LAB + D_OUT]
    sq = diff * diff

    # ---- one merged cross-lane reduce: entropy, log-probs, MSE loss ----------
    el = jnp.concatenate([ent_summand, lp_summand], axis=0)               # (2TB, N_BITS)
    el = jnp.concatenate(
        [el, jnp.zeros((2 * tb, D_OUT - N_BITS), jnp.float32)], axis=1)   # (2TB, D_OUT)
    sums = jnp.sum(jnp.concatenate([el, sq], axis=0), axis=1, keepdims=True)
    entropy = sums[:tb]
    log_probs = sums[tb:2 * tb]
    loss = sums[2 * tb:] * (1.0 / D_OUT)            # per-sample MSE

    # ---- NVIL surrogate (forward values; detach is a forward no-op) ----------
    adv = loss - baseline
    full = adv * log_probs + loss + adv * adv - ENCODER_ENTROPY_COEFF * entropy

    # ---- packed lane-dense output: static-offset stores into the VMEM block;
    #      the HBM writeback stays a single unmasked full-tile DMA. ------------
    out_ref[:, _COL_FULL:_COL_FULL + 1] = full
    out_ref[:, _COL_LOSS:_COL_LOSS + 1] = loss
    out_ref[:, _COL_BASE:_COL_BASE + 1] = baseline
    out_ref[:, _COL_ENT:_COL_ENT + 1] = entropy
    out_ref[:, _COL_SCORES:_COL_SCORES + N_BITS] = scores
    out_ref[:, _COL_Z:_COL_Z + N_BITS] = z
    out_ref[:, _COL_DEC:_COL_DEC + D_OUT] = dec_out
    out_ref[:, _USED_COLS:OUT_W] = jnp.zeros((tb, OUT_W - _USED_COLS), jnp.float32)


def prepare_weights(params):
    """One-time fusion of all module parameters into a single zero-padded weight
    buffer (biases folded against the ones column of the activation slab).
    Hoisted out of the per-call path."""
    w_enc, b_enc, w_base, b_base, w_dec, w_dec2, b_dec = params
    w = jnp.zeros((W_ROWS, W_COLS), jnp.float32)
    # matmul #1: rows are indexed by activation-slab column
    w = w.at[_A_X:_A_X + D_IN, _M_SCORES:_M_SCORES + N_BITS].set(w_enc)
    w = w.at[_A_ONE, _M_SCORES:_M_SCORES + N_BITS].set(b_enc[0])
    w = w.at[_A_X:_A_X + D_IN, _M_BASE].set(w_base[:, 0])
    w = w.at[_A_ONE, _M_BASE].set(b_base[0, 0])
    w = w.at[_A_DEC:_A_DEC + D_DEC, _M_DEC:_M_DEC + D_OUT].set(w_dec2)
    w = w.at[_A_ONE, _M_DEC:_M_DEC + D_OUT].set(b_dec[0])
    # matmul #2: z-part of the decoder, same output columns as matmul #1
    w = w.at[W_Z_ROW:W_Z_ROW + N_BITS, _M_DEC:_M_DEC + D_OUT].set(w_dec)
    return w


@jax.jit
def bitvector_nvil_forward(x, dec_in, labels, u, w_all):
    b = x.shape[0]
    # Pack all per-sample inputs (plus the bias ones column) into ONE lane-dense
    # (B, 128) slab: a single full-tile input DMA and no in-kernel lane concats.
    act = jnp.concatenate(
        [x, jnp.ones((b, 1), jnp.float32), dec_in, labels, u,
         jnp.zeros((b, ACT_W - _ACT_USED), jnp.float32)], axis=1)

    tb = b if b <= 256 else 256           # rows per grid step (single block at B=8)
    assert b % tb == 0
    # TODO(synk): at training batch sizes cast the matmul operands to bf16
    #             (keep preferred_element_type=f32); kept f32 here so the binary
    #             sample z stays bit-robust against the f32 reference.
    slab = pl.pallas_call(
        nvil_kernel,
        out_shape=jax.ShapeDtypeStruct((b, OUT_W), jnp.float32),
        grid_spec=pltpu.PrefetchScalarGridSpec(
            num_scalar_prefetch=0,
            grid=(b // tb,),
            in_specs=[
                pl.BlockSpec((tb, ACT_W), lambda i: (i, 0)),
                pl.BlockSpec((W_ROWS, W_COLS), lambda i: (0, 0)),  # weights: fetched once
            ],
            out_specs=pl.BlockSpec((tb, OUT_W), lambda i: (i, 0)),
        ),
        compiler_params=pltpu.CompilerParams(
            dimension_semantics=("parallel",)),   # uses both v7x TCs at real batch sizes
    )(act, w_all)

    full_loss = jnp.mean(slab[:, _COL_FULL])
    loss = slab[:, _COL_LOSS]
    baseline = slab[:, _COL_BASE]
    entropy = slab[:, _COL_ENT]
    scores = slab[:, _COL_SCORES:_COL_SCORES + N_BITS]
    z = slab[:, _COL_Z:_COL_Z + N_BITS]
    dec_out = slab[:, _COL_DEC:_COL_DEC + D_OUT]

    logs = {
        "baseline": baseline,
        "loss": jnp.mean(loss),
        "encoder_entropy": jnp.mean(entropy),
        "distr_logits": scores,   # stands in for the torch Bernoulli distribution object
        "latent_z": z,
        "decoder_output": dec_out,
    }
    return {"loss": full_loss, "log": logs}


def _reference_forward(x, dec_in, labels, u, params):
    """Pure-JAX reference mirroring the PyTorch semantics (for verification)."""
    w_enc, b_enc, w_base, b_base, w_dec, w_dec2, b_dec = params
    scores = x @ w_enc + b_enc
    p = jax.nn.sigmoid(scores)
    z = (u < p).astype(jnp.float32)
    entropy = jnp.sum(p * jax.nn.softplus(-scores)
                      + (1 - p) * jax.nn.softplus(scores), axis=1)
    log_probs = jnp.sum(z * scores - jax.nn.softplus(scores), axis=1)
    dec_out = z @ w_dec + dec_in @ w_dec2 + b_dec
    loss = jnp.mean((dec_out - labels) ** 2, axis=1)
    baseline = (x @ w_base + b_base)[:, 0]
    policy_loss = (loss - baseline) * log_probs
    entropy_loss = -entropy * ENCODER_ENTROPY_COEFF
    mse = (loss - baseline) ** 2
    full = jnp.mean(policy_loss + loss + mse + entropy_loss)
    return dict(full=full, loss=loss, baseline=baseline, entropy=entropy,
                scores=scores, z=z, dec_out=dec_out)


if __name__ == "__main__":
    key = jax.random.PRNGKey(0)
    keys = jax.random.split(key, 10)

    # deterministic synthetic parameters (PyTorch-Linear-like, stored transposed)
    w_enc = 0.1 * jax.random.normal(keys[0], (D_IN, N_BITS), jnp.float32)
    b_enc = 0.01 * jax.random.normal(keys[1], (1, N_BITS), jnp.float32)
    w_base = 0.1 * jax.random.normal(keys[2], (D_IN, 1), jnp.float32)
    b_base = jnp.zeros((1, 1), jnp.float32)
    w_dec = 0.1 * jax.random.normal(keys[3], (N_BITS, D_OUT), jnp.float32)
    w_dec2 = 0.1 * jax.random.normal(keys[4], (D_DEC, D_OUT), jnp.float32)
    b_dec = 0.01 * jax.random.normal(keys[5], (1, D_OUT), jnp.float32)
    params = (w_enc, b_enc, w_base, b_base, w_dec, w_dec2, b_dec)

    # deterministic example inputs
    x = jax.random.normal(keys[6], (B, D_IN), jnp.float32)        # encoder_input
    dec_in = jax.random.normal(keys[7], (B, D_DEC), jnp.float32)  # decoder_input
    labels = jax.random.normal(keys[8], (B, D_OUT), jnp.float32)  # labels
    # uniform noise driving the Bernoulli sample (makes sampling deterministic)
    u = jax.random.uniform(keys[9], (B, N_BITS), jnp.float32)

    # one-time, hoisted weight fusion (review item #1 / #3)
    w_all = jax.block_until_ready(prepare_weights(params))

    out = bitvector_nvil_forward(x, dec_in, labels, u, w_all)
    jax.block_until_ready(out)

    ref = _reference_forward(x, dec_in, labels, u, params)
    lg = out["log"]
    assert jnp.allclose(out["loss"], ref["full"], rtol=1e-5, atol=1e-5), \
        (out["loss"], ref["full"])
    assert jnp.allclose(lg["baseline"], ref["baseline"], rtol=1e-5, atol=1e-5)
    assert jnp.allclose(lg["loss"], jnp.mean(ref["loss"]), rtol=1e-5, atol=1e-5)
    assert jnp.allclose(lg["encoder_entropy"], jnp.mean(ref["entropy"]),
                        rtol=1e-5, atol=1e-5)
    assert jnp.allclose(lg["distr_logits"], ref["scores"], rtol=1e-5, atol=1e-5)
    assert jnp.allclose(lg["latent_z"], ref["z"])
    assert jnp.allclose(lg["decoder_output"], ref["dec_out"], rtol=1e-5, atol=1e-5)

    print("KERNEL_OK")
</pallas_src>

<mosaic_0001>
module attributes {stable_mosaic.version = 11 : i64} {
  func.func @nvil_kernel(%arg0: i32, %arg1: memref<8x128xf32, #tpu.memory_space<vmem>>, %arg2: memref<144x64xf32, #tpu.memory_space<vmem>>, %arg3: memref<8x128xf32, #tpu.memory_space<vmem>>) attributes {dimension_semantics = [#tpu.dimension_semantics<parallel>], iteration_bounds = array<i64: 1>, scalar_prefetch = 0 : i64, scratch_operands = 0 : i64, tpu.core_type = #tpu.core_type<tc>, window_params = [{transform_indices = @transform_0, window_bounds = array<i64: 8, 128>}, {pipeline_mode = #tpu.pipeline_mode<synchronous>, transform_indices = @transform_1, window_bounds = array<i64: 144, 64>}, {transform_indices = @transform_2, window_bounds = array<i64: 8, 128>}]} {
    %c0 = arith.constant 0 : index
    %c0_0 = arith.constant 0 : index
    %0 = vector.load %arg1[%c0, %c0_0] : memref<8x128xf32, #tpu.memory_space<vmem>>, vector<8x128xf32>
    %c0_1 = arith.constant 0 : index
    %c0_2 = arith.constant 0 : index
    %1 = vector.load %arg2[%c0_1, %c0_2] : memref<144x64xf32, #tpu.memory_space<vmem>>, vector<144x64xf32>
    %2 = vector.extract_strided_slice %1 {offsets = [0, 0], sizes = [128, 64], strides = [1, 1]} : vector<144x64xf32> to vector<128x64xf32>
    %cst = arith.constant dense<0.000000e+00> : vector<8x64xf32>
    %3 = tpu.matmul %0, %2, %cst {dimension_numbers = #tpu.dot_dimension_numbers<[1], [0], [0], [1], [0, 0, 1, 1], [], []>} : vector<8x128xf32>, vector<128x64xf32>, vector<8x64xf32> -> vector<8x64xf32>
    %4 = vector.extract_strided_slice %3 {offsets = [0, 0], sizes = [8, 16], strides = [1, 1]} : vector<8x64xf32> to vector<8x16xf32>
    %5 = vector.extract_strided_slice %3 {offsets = [0, 16], sizes = [8, 1], strides = [1, 1]} : vector<8x64xf32> to vector<8x1xf32>
    %6 = math.absf %4 : vector<8x16xf32>
    %cst_3 = arith.constant 0.000000e+00 : f32
    %7 = vector.broadcast %cst_3 : f32 to vector<8x16xf32>
    %8 = arith.subf %7, %6 : vector<8x16xf32>
    %cst_4 = arith.constant 0.000000e+00 : f32
    %9 = vector.broadcast %cst_4 : f32 to vector<8x16xf32>
    %10 = arith.maximumf %8, %9 : vector<8x16xf32>
    %11 = vector.broadcast %cst_4 : f32 to vector<8x16xf32>
    %12 = arith.subf %8, %11 : vector<8x16xf32>
    %13 = arith.cmpf one, %12, %12 : vector<8x16xf32>
    %14 = vector.broadcast %cst_4 : f32 to vector<8x16xf32>
    %15 = arith.addf %8, %14 : vector<8x16xf32>
    %16 = math.absf %12 : vector<8x16xf32>
    %cst_5 = arith.constant 0.000000e+00 : f32
    %17 = vector.broadcast %cst_5 : f32 to vector<8x16xf32>
    %18 = arith.subf %17, %16 : vector<8x16xf32>
    %19 = math.exp %18 : vector<8x16xf32>
    %20 = math.log1p %19 : vector<8x16xf32>
    %21 = arith.addf %10, %20 : vector<8x16xf32>
    %22 = arith.select %13, %15, %21 : vector<8x16xi1>, vector<8x16xf32>
    %cst_6 = arith.constant 0.000000e+00 : f32
    %23 = vector.broadcast %cst_6 : f32 to vector<8x16xf32>
    %24 = arith.maximumf %4, %23 : vector<8x16xf32>
    %25 = arith.addf %24, %22 : vector<8x16xf32>
    %26 = arith.subf %25, %4 : vector<8x16xf32>
    %cst_7 = arith.constant 0.000000e+00 : f32
    %27 = vector.broadcast %cst_7 : f32 to vector<8x16xf32>
    %28 = arith.subf %27, %26 : vector<8x16xf32>
    %29 = math.exp %28 : vector<8x16xf32>
    %30 = vector.extract_strided_slice %0 {offsets = [0, 97], sizes = [8, 16], strides = [1, 1]} : vector<8x128xf32> to vector<8x16xf32>
    %31 = arith.cmpf olt, %30, %29 : vector<8x16xf32>
    %32 = arith.extui %31 : vector<8x16xi1> to vector<8x16xi32>
    %33 = arith.sitofp %32 : vector<8x16xi32> to vector<8x16xf32>
    %34 = arith.mulf %29, %4 : vector<8x16xf32>
    %35 = arith.subf %25, %34 : vector<8x16xf32>
    %36 = arith.mulf %33, %4 : vector<8x16xf32>
    %37 = arith.subf %36, %25 : vector<8x16xf32>
    %38 = vector.extract_strided_slice %1 {offsets = [128, 0], sizes = [16, 64], strides = [1, 1]} : vector<144x64xf32> to vector<16x64xf32>
    %cst_8 = arith.constant dense<0.000000e+00> : vector<8x64xf32>
    %39 = tpu.matmul %33, %38, %cst_8 {dimension_numbers = #tpu.dot_dimension_numbers<[1], [0], [0], [1], [0, 0, 1, 1], [], []>} : vector<8x16xf32>, vector<16x64xf32>, vector<8x64xf32> -> vector<8x64xf32>
    %40 = arith.addf %3, %39 : vector<8x64xf32>
    %41 = vector.extract_strided_slice %40 {offsets = [0, 17], sizes = [8, 32], strides = [1, 1]} : vector<8x64xf32> to vector<8x32xf32>
    %42 = vector.extract_strided_slice %0 {offsets = [0, 65], sizes = [8, 32], strides = [1, 1]} : vector<8x128xf32> to vector<8x32xf32>
    %43 = arith.subf %41, %42 : vector<8x32xf32>
    %44 = arith.mulf %43, %43 : vector<8x32xf32>
    %45 = tpu.concatenate %35, %37 in 0 : vector<8x16xf32>, vector<8x16xf32> -> vector<16x16xf32>
    %cst_9 = arith.constant 0.000000e+00 : f32
    %46 = vector.broadcast %cst_9 : f32 to vector<16x16xf32>
    %47 = tpu.concatenate %45, %46 in 1 : vector<16x16xf32>, vector<16x16xf32> -> vector<16x32xf32>
    %48 = tpu.concatenate %47, %44 in 0 : vector<16x32xf32>, vector<8x32xf32> -> vector<24x32xf32>
    %cst_10 = arith.constant dense<0.000000e+00> : vector<24xf32>
    %49 = vector.multi_reduction <add>, %48, %cst_10 [1] : vector<24x32xf32> to vector<24xf32>
    %50 = vector.shape_cast %49 : vector<24xf32> to vector<24x1xf32>
    %51 = vector.extract_strided_slice %50 {offsets = [0, 0], sizes = [8, 1], strides = [1, 1]} : vector<24x1xf32> to vector<8x1xf32>
    %52 = vector.extract_strided_slice %50 {offsets = [8, 0], sizes = [8, 1], strides = [1, 1]} : vector<24x1xf32> to vector<8x1xf32>
    %53 = vector.extract_strided_slice %50 {offsets = [16, 0], sizes = [8, 1], strides = [1, 1]} : vector<24x1xf32> to vector<8x1xf32>
    %cst_11 = arith.constant 3.125000e-02 : f32
    %54 = vector.broadcast %cst_11 : f32 to vector<8x1xf32>
    %55 = arith.mulf %53, %54 : vector<8x1xf32>
    %56 = arith.subf %55, %5 : vector<8x1xf32>
    %57 = arith.mulf %56, %52 : vector<8x1xf32>
    %58 = arith.addf %57, %55 : vector<8x1xf32>
    %59 = arith.mulf %56, %56 : vector<8x1xf32>
    %60 = arith.addf %58, %59 : vector<8x1xf32>
    %cst_12 = arith.constant 1.000000e-01 : f32
    %61 = vector.broadcast %cst_12 : f32 to vector<8x1xf32>
    %62 = arith.mulf %61, %51 : vector<8x1xf32>
    %63 = arith.subf %60, %62 : vector<8x1xf32>
    %c0_13 = arith.constant 0 : index
    %c0_14 = arith.constant 0 : index
    %64 = vector.load %arg3[%c0_13, %c0_14] : memref<8x128xf32, #tpu.memory_space<vmem>>, vector<8x1xf32>
    tpu.vector_store %arg3[%c0_13, %c0_14], %63 {strides = array<i32>} : memref<8x128xf32, #tpu.memory_space<vmem>>, vector<8x1xf32>,
    %c0_15 = arith.constant 0 : index
    %c1 = arith.constant 1 : index
    %65 = vector.load %arg3[%c0_15, %c1] : memref<8x128xf32, #tpu.memory_space<vmem>>, vector<8x1xf32>
    tpu.vector_store %arg3[%c0_15, %c1], %55 {strides = array<i32>} : memref<8x128xf32, #tpu.memory_space<vmem>>, vector<8x1xf32>,
    %c0_16 = arith.constant 0 : index
    %c2 = arith.constant 2 : index
    %66 = vector.load %arg3[%c0_16, %c2] : memref<8x128xf32, #tpu.memory_space<vmem>>, vector<8x1xf32>
    tpu.vector_store %arg3[%c0_16, %c2], %5 {strides = array<i32>} : memref<8x128xf32, #tpu.memory_space<vmem>>, vector<8x1xf32>,
    %c0_17 = arith.constant 0 : index
    %c3 = arith.constant 3 : index
    %67 = vector.load %arg3[%c0_17, %c3] : memref<8x128xf32, #tpu.memory_space<vmem>>, vector<8x1xf32>
    tpu.vector_store %arg3[%c0_17, %c3], %51 {strides = array<i32>} : memref<8x128xf32, #tpu.memory_space<vmem>>, vector<8x1xf32>,
    %c0_18 = arith.constant 0 : index
    %c4 = arith.constant 4 : index
    %68 = vector.load %arg3[%c0_18, %c4] : memref<8x128xf32, #tpu.memory_space<vmem>>, vector<8x16xf32>
    tpu.vector_store %arg3[%c0_18, %c4], %4 {strides = array<i32>} : memref<8x128xf32, #tpu.memory_space<vmem>>, vector<8x16xf32>,
    %c0_19 = arith.constant 0 : index
    %c20 = arith.constant 20 : index
    %69 = vector.load %arg3[%c0_19, %c20] : memref<8x128xf32, #tpu.memory_space<vmem>>, vector<8x16xf32>
    tpu.vector_store %arg3[%c0_19, %c20], %33 {strides = array<i32>} : memref<8x128xf32, #tpu.memory_space<vmem>>, vector<8x16xf32>,
    %c0_20 = arith.constant 0 : index
    %c36 = arith.constant 36 : index
    %70 = vector.load %arg3[%c0_20, %c36] : memref<8x128xf32, #tpu.memory_space<vmem>>, vector<8x32xf32>
    tpu.vector_store %arg3[%c0_20, %c36], %41 {strides = array<i32>} : memref<8x128xf32, #tpu.memory_space<vmem>>, vector<8x32xf32>,
    %cst_21 = arith.constant 0.000000e+00 : f32
    %71 = vector.broadcast %cst_21 : f32 to vector<8x60xf32>
    %c0_22 = arith.constant 0 : index
    %c68 = arith.constant 68 : index
    %72 = vector.load %arg3[%c0_22, %c68] : memref<8x128xf32, #tpu.memory_space<vmem>>, vector<8x60xf32>
    tpu.vector_store %arg3[%c0_22, %c68], %71 {strides = array<i32>} : memref<8x128xf32, #tpu.memory_space<vmem>>, vector<8x60xf32>,
    return
  }
  func.func @transform_0(%arg0: i32) -> (i32, i32) {
    %c0_i32 = arith.constant 0 : i32
    %c0_i32_0 = arith.constant 0 : i32
    return %arg0, %c0_i32 : i32, i32
  }
  func.func @transform_1(%arg0: i32) -> (i32, i32) {
    %c0_i32 = arith.constant 0 : i32
    %c0_i32_0 = arith.constant 0 : i32
    %c0_i32_1 = arith.constant 0 : i32
    return %c0_i32, %c0_i32_0 : i32, i32
  }
  func.func @transform_2(%arg0: i32) -> (i32, i32) {
    %c0_i32 = arith.constant 0 : i32
    %c0_i32_0 = arith.constant 0 : i32
    return %arg0, %c0_i32 : i32, i32
  }
}

</mosaic_0001>

<bundles_post_ra>
// kernel: bitvector_nvil_forward.1
= control target key start
LH: loop header
LB: loop body
LE: loop exit
PB: predicated region body
PF: predicated region fallthrough
CT: control target
= control target key end

     0   :  { %v374_v0 = vmov 0.0   ;;  %vm375_vm0 = vmmov 0   ;;  %s376_s21 = smov 80   ;;  %s377_s15 = smov 97   ;;  %vm148_vm4 = vcmask 130048   ;;  %vm238_vm5 = vcmask 261120   ;;  %s525_s1 = inlined_call_operand.vmem [shape: f32[144,64], index: 1, kind: input, shape index: {}]   ;;  %s526_s0 = inlined_call_operand.vmem [shape: f32[8,128], index: 0, kind: input, shape index: {}]   ;;  %s527_s2 = inlined_call_operand.vmem [shape: f32[8,128], index: 2, kind: output, shape index: {}]  }
   0x1   :  { %315 = vmatprep.subr.mxu0 %v374_v0  ;;  %v27_v1 = vld [vmem:[%s525_s1 + $0x78] sm:$0xff]  ;;  %v26_v2 = vld [vmem:[%s525_s1 + $0x70] sm:$0xff]  ;;  %347 = vmatprep.mubr.msk.f32.mxu0 %vm375_vm0, %v374_v0  ;;  %v25_v3 = vld [vmem:[%s525_s1 + $0x68] sm:$0xff]  ;;  %s378_s20 = smov 31   ;;  %s381_s22 = smov 111   ;;  %vm260_vm6 = vcmask 7168  }
   0x2   :  { %316 = vmatpush3.msra.mxu0 %v27_v1  ;;  %350 = vmatprep.subr.mxu1 %v374_v0  ;;  %v24_v4 = vld [vmem:[%s525_s1 + $0x60] sm:$0xff]  ;;  %v23_v6 = vld [vmem:[%s525_s1 + $0x58] sm:$0xff]  ;;  %v22_v7 = vld [vmem:[%s525_s1 + $0x50] sm:$0xff]  ;;  %s382_s23 = smov 112   ;;  %s384_s24 = smov 51   ;;  %vm262_vm7 = vcmask 15368  }
   0x3   :  { %317 = vmatprep.subr.mxu0 %v374_v0  ;;  %354 = vmatprep.mubr.msk.f32.mxu1 %vm375_vm0, %v374_v0  ;;  %v421_v5 = vld [vmem:[%s526_s0] sm:$0xff]  ;;  %v21_v8 = vld [vmem:[%s525_s1 + $0x48] sm:$0xff]  ;;  %v19_v10 = vld [vmem:[%s525_s1 + $0x38] sm:$0xff]  ;;  %s383_s0 = smov 4   ;;  %vm267_vm8 = vcmask 23568   ;;  %vm269_vm9 = vcmask 31768  }
   0x4   :  { %318 = vmatpush3.msra.mxu0 %v26_v2  ;;  %223 = vrot.lane.b32.xlu1 %v421_v5, %s376_s21  ;;  %v20_v9 = vld [vmem:[%s525_s1 + $0x40] sm:$0xff]  ;;  %v18_v11 = vld [vmem:[%s525_s1 + $0x30] sm:$0xff]  ;;  %v17_v12 = vld [vmem:[%s525_s1 + $0x28] sm:$0xff]  ;;  %s380_s21 = smov 19   ;;  %vm274_vm10 = vcmask 162848   ;;  %vm279_vm11 = vcmask 294048  }
   0x5   :  { %319 = vmatprep.subr.mxu0 %v374_v0  ;;  %v16_v13 = vld [vmem:[%s525_s1 + $0x20] sm:$0xff]  ;;  %v15_v14 = vld [vmem:[%s525_s1 + $0x18] sm:$0xff]  ;;  %v14_v15 = vld [vmem:[%s525_s1 + $0x10] sm:$0xff]  ;;  %vm285_vm12 = vcmask 556320   ;;  %vm287_vm13 = vcmask 1048096  }
   0x6   :  { %320 = vmatpush3.msra.mxu0 %v25_v3  ;;  %v13_v16 = vld [vmem:[%s525_s1 + $0x8] sm:$0xff]  ;;  %v12_v17 = vld [vmem:[%s525_s1] sm:$0xff] }
   0x7   :  { %321 = vmatprep.subr.mxu0 %v374_v0  ;;  %v29_v42 = vld [vmem:[%s525_s1 + $0x88] sm:$0xff]  ;;  %v28_v43 = vld [vmem:[%s525_s1 + $0x80] sm:$0xff]  ;;  %s379_s1 = smov 114  }
   0x8   :  { %322 = vmatpush3.msra.mxu0 %v24_v4  ;;  %351 = vmatpush3.msra.mxu1 %v29_v42 }
   0x9   :  { %323 = vmatprep.subr.mxu0 %v374_v0  ;;  %352 = vmatprep.subr.mxu1 %v374_v0 }
   0xa   :  { %324 = vmatpush3.msra.mxu0 %v23_v6  ;;  %353 = vmatpush3.msra.mxu1 %v28_v43 }
   0xb   :  { %325 = vmatprep.subr.mxu0 %v374_v0 }
   0xc   :  { %326 = vmatpush3.msra.mxu0 %v22_v7 }
   0xd   :  { %327 = vmatprep.subr.mxu0 %v374_v0 }
   0xe   :  { %328 = vmatpush3.msra.mxu0 %v21_v8 }
   0xf   :  { %329 = vmatprep.subr.mxu0 %v374_v0 }
  0x10   :  { %330 = vmatpush3.msra.mxu0 %v20_v9 }
  0x11   :  { %331 = vmatprep.subr.mxu0 %v374_v0 }
  0x12   :  { %332 = vmatpush3.msra.mxu0 %v19_v10 }
  0x13   :  { %333 = vmatprep.subr.mxu0 %v374_v0 }
  0x14   :  { %334 = vmatpush3.msra.mxu0 %v18_v11 }
  0x15   :  { %335 = vmatprep.subr.mxu0 %v374_v0 }
  0x16   :  { %336 = vmatpush3.msra.mxu0 %v17_v12 }
  0x17   :  { %337 = vmatprep.subr.mxu0 %v374_v0 }
  0x18   :  { %338 = vmatpush3.msra.mxu0 %v16_v13 }
  0x19   :  { %339 = vmatprep.subr.mxu0 %v374_v0 }
  0x1a   :  { %340 = vmatpush3.msra.mxu0 %v15_v14 }
  0x1b   :  { %341 = vmatprep.subr.mxu0 %v374_v0 }
  0x1c   :  { %342 = vmatpush3.msra.mxu0 %v14_v15 }
  0x1d   :  { %343 = vmatprep.subr.mxu0 %v374_v0 }
  0x1e   :  { %344 = vmatpush3.msra.mxu0 %v13_v16 }
  0x1f   :  { %345 = vmatprep.subr.mxu0 %v374_v0 }
  0x20   :  { %346 = vmatpush3.msra.mxu0 %v12_v17 }
  0x21   :  { %348 = vmatmul.mubr.f32.vlgmr.msra.gmra.mxu0 %v421_v5 }
  0x76   :  { %v224_v47 = vpop.permute.xlu1 %223 }
  0xe1   :  { %v474_v18 = vpop.f32.mrf.mxu0 }
  0xe2   :  { %v100_v19 = vand.u32 2147483647, %v474_v18  ;;  %136 = vrot.lane.b32.xlu1 %v474_v18, %s377_s15  ;;  %v120_v36 = vmax.f32 %v474_v18, 0.0 }
  0xe3   :  { %v349_v20 = vpop.f32.mrf.mxu0 }
  0xe4   :  { %v101_v21 = vsub.f32 0.0, %v100_v19 }
  0xe6   :  { %v105_v22 = vand.u32 2147483647, %v101_v21  ;;  %v102_v33 = vmax.f32 %v101_v21, 0.0  ;;  %vm103_vm2 = vcmp.ne.f32.partialorder %v101_v21, %v101_v21 }
  0xe8   :  { %v106_v23 = vsub.f32 0.0, %v105_v22 }
  0xea   :  { %v107_v24 = vmul.f32 1.442695, %v106_v23 }
  0xec   :  { %368 = vpow2.f32 %v107_v24 }
  0xf9   :  { %v369_v25 = vpop.eup %368 }
  0xfa   :  { %v109_v26 = vadd.f32 1.0, %v369_v25  ;;  %v112_v27 = vmul.f32 -0.5, %v369_v25  ;;  %v115_v29 = vand.u32 2147483647, %v369_v25 }
  0xfc   :  { %370 = vlog2.f32 %v109_v26  ;;  %v113_v28 = vadd.f32 1.0, %v112_v27  ;;  %vm116_vm1 = vcmp.lt.f32.partialorder %v115_v29, 0.0004427343 }
  0xfe   :  { %v114_v32 = vmul.f32 %v369_v25, %v113_v28 }
 0x109   :  { %v371_v30 = vpop.eup %370 }
 0x10a   :  { %v111_v31 = vmul.f32 0.6931472, %v371_v30 }
 0x10c   :  { %v117_v34 = vsel %vm116_vm1, %v114_v32, %v111_v31 }
 0x10d   :  { %v118_v35 = vadd.f32 %v117_v34, %v102_v33 }
 0x10f   :  { %v119_v37 = vsel %vm103_vm2, %v101_v21, %v118_v35 }
 0x110   :  { %v121_v38 = vadd.f32 %v120_v36, %v119_v37 }
 0x112   :  { %v122_v39 = vsub.f32 %v121_v38, %v474_v18 }
 0x114   :  { %v123_v40 = vsub.f32 0.0, %v122_v39 }
 0x116   :  { %v124_v41 = vmul.f32 1.442695, %v123_v40 }
 0x118   :  { %372 = vpow2.f32 %v124_v41 }
 0x125   :  { %v373_v44 = vpop.eup %372 }
 0x126   :  { %127 = vrot.lane.b32.xlu0 %v373_v44, %s377_s15  ;;  %v133_v53 = vmul.f32 %v373_v44, %v474_v18 }
 0x128   :  { %v134_v54 = vsub.f32 %v121_v38, %v133_v53 }
 0x12a   :  { %v232_v58 = vsel %vm148_vm4, %v134_v54, 0.0 }
 0x12b   :  { %v239_v59 = vsel %vm238_vm5, %v232_v58, 0.0 }
 0x154   :  { %v137_v49 = vpop.permute.xlu1 %136 }
 0x198   :  { %v128_v45 = vpop.permute.xlu0 %127 }
 0x199   :  { %vm130_vm3 = vcmp.lt.f32.partialorder %v421_v5, %v128_v45 }
 0x19a   :  { %v293_v46 = vsel %vm130_vm3, 1.0, %v374_v0 }
 0x19b   :  { %146 = vrot.lane.b32.xlu0 %v293_v46, %s378_s20  ;;  %v139_v50 = vmul.f32 %v293_v46, %v137_v49 }
 0x19f   :  { %141 = vrot.lane.b32.xlu0 %v121_v38, %s377_s15 }
 0x20d   :  { %v147_v48 = vpop.permute.xlu0 %146 }
 0x20e   :  { %355 = vmatmul.mubr.msk.f32.vlgmr.msra.gmra.mxu1 %vm148_vm4, %v147_v48 }
 0x211   :  { %v142_v51 = vpop.permute.xlu0 %141 }
 0x212   :  { %v144_v52 = vsub.f32 %v139_v50, %v142_v51 }
 0x214   :  { %229 = vrot.lane.b32.xlu0 %v144_v52, %s378_s20 }
 0x286   :  { %v230_v55 = vpop.permute.xlu0 %229 }
 0x287   :  { %v233_v56 = vsel %vm148_vm4, %v230_v55, 0.0 }
 0x288   :  { %v242_v57 = vsel %vm238_vm5, %v233_v56, 0.0 }
 0x289   :  { %243 = vadd.xlane.f32.xlu0 %v242_v57 }
 0x28d   :  { %240 = vadd.xlane.f32.xlu0 %v239_v59 }
 0x2a3   :  { %264 = vrot.lane.b32.xlu0 %v474_v18, %s379_s1 }
 0x2ce   :  { %v217_v60 = vpop.f32.mrf.mxu1 }
 0x2cf   :  { %v221_v61 = vadd.f32 %v217_v60, %v474_v18 }
 0x2d0   :  { %v356_v62 = vpop.f32.mrf.mxu1 }
 0x2d1   :  { %v226_v63 = vsub.f32 %v221_v61, %v224_v47  ;;  %282 = vrot.lane.b32.xlu0 %v221_v61, %s380_s21 }
 0x2d3   :  { %v227_v1 = vmul.f32 %v226_v63, %v226_v63 }
 0x2d5   :  { %235 = vrot.lane.b32.xlu1 %v227_v1, %s381_s22 }
 0x312   :  { %v244_v4 = vpop.xlane.xlu0 %243 }
 0x316   :  { %v241_v9 = vpop.xlane.xlu0 %240 }
 0x317   :  { %v254_v12 = vmul.f32 0.1, %v241_v9 }
 0x31a   :  { %v265_v16 = vpop.permute.xlu0 %264 }
 0x343   :  { %v283_v19 = vpop.permute.xlu0 %282 }
 0x347   :  { %v236_v2 = vpop.permute.xlu1 %235 }
 0x348   :  { %v245_v3 = vsel %vm238_vm5, %v236_v2, 0.0 }
 0x349   :  { %246 = vadd.xlane.f32.xlu1 %v245_v3 }
 0x3d2   :  { %v247_v5 = vpop.xlane.xlu1 %246 }
 0x3d3   :  { %v248_v6 = vmul.f32 0.03125, %v247_v5 }
 0x3d5   :  { %v249_v7 = vsub.f32 %v248_v6, %v474_v18 }
 0x3d7   :  { %v250_v8 = vmul.f32 %v249_v7, %v244_v4  ;;  %v252_v11 = vmul.f32 %v249_v7, %v249_v7 }
 0x3d9   :  { %v251_v10 = vadd.f32 %v250_v8, %v248_v6 }
 0x3db   :  { %v253_v13 = vadd.f32 %v252_v11, %v251_v10 }
 0x3dd   :  { %v255_v14 = vsub.f32 %v253_v13, %v254_v12 }
 0x3df   :  { %257 = vrot.lane.b32.xlu1 %v255_v14, %s382_s23 }
 0x3e3   :  { %271 = vrot.lane.b32.xlu1 %v474_v18, %s383_s0 }
 0x3e7   :  { %276 = vrot.lane.b32.xlu1 %v293_v46, %s384_s24 }
 0x451   :  { %v258_v15 = vpop.permute.xlu1 %257 }
 0x452   :  { %261 = vst.msk [vmem:[%s527_s2] sm:$0xff] %vm260_vm6, %v258_v15 }
 0x453   :  { %263 = vst.msk [vmem:[%s527_s2] sm:$0xff] %vm262_vm7, %v248_v6 }
 0x454   :  { %268 = vst.msk [vmem:[%s527_s2] sm:$0xff] %vm267_vm8, %v265_v16 }
 0x455   :  { %v272_v17 = vpop.permute.xlu1 %271  ;;  %270 = vst.msk [vmem:[%s527_s2] sm:$0xff] %vm269_vm9, %v241_v9 }
 0x456   :  { %275 = vst.msk [vmem:[%s527_s2] sm:$0xff] %vm274_vm10, %v272_v17 }
 0x459   :  { %v277_v18 = vpop.permute.xlu1 %276 }
 0x45a   :  { %280 = vst.msk [vmem:[%s527_s2] sm:$0xff] %vm279_vm11, %v277_v18 }
 0x45b   :  { %286 = vst.msk [vmem:[%s527_s2] sm:$0xff] %vm285_vm12, %v283_v19 }
 0x45c   :  { %288 = vst.msk [vmem:[%s527_s2] sm:$0xff] %vm287_vm13, %v374_v0 }

</bundles_post_ra>
